<compile_context>
chip_gen: v5e
topology: v5e:2x2
jax: 0.10.0
libtpu: 0.0.40
codegen_flags: <defaults>
</compile_context>

<pallas_src>
import jax
import jax.numpy as jnp
from jax.experimental import pallas as pl
from jax.experimental.pallas import tpu as pltpu


def _gating_kernel(emb_ref, wt_ref, b_ref, o_ref):
    x = emb_ref[...]                                    # (tm, D), streamed dtype
    xc = x.astype(wt_ref.dtype)                         # bf16 operands -> 1 MXU pass
    z = jnp.dot(xc, wt_ref[...],
                preferred_element_type=jnp.float32)     # MXU, f32 accumulation
    z = z + b_ref[...]                                  # (1, D) f32 bias broadcast
    g = jax.nn.sigmoid(z)                               # EUP, f32
    o_ref[...] = (x.astype(jnp.float32) * g).astype(o_ref.dtype)


def _round_up(x, m):
    return (x + m - 1) // m * m


def _auto_block_rows(N, D, in_bytes, out_bytes, w_bytes,
                     vmem_budget=12 << 20, max_rows=4096, min_steps=4):
    """Largest row tile that fits the budget, keeping a multi-step grid."""
    per_row = 2 * D * (in_bytes + out_bytes)            # double-buffered in + out
    resident = 2 * D * D * w_bytes + 2 * D * 4          # weight + bias buffers
    avail = max(vmem_budget - resident, per_row * 64)
    tm = avail // per_row
    # Keep >= min_steps grid steps when N is large so the "parallel" row axis
    # can shard across TensorCores (v7x) and the pipeline has work to overlap.
    if N >= 2 * 16 * min_steps:
        tm = min(tm, _round_up(-(-N // min_steps), 16))
    return int(min(tm, max_rows))


def gating_layer(emb, w, b, *, block_rows=None, compute_dtype=jnp.bfloat16,
                 out_dtype=None):
    """out = emb * sigmoid(emb @ w.T + b)   (nn.Linear + Sigmoid gate).

    emb: [N, D]; w: [D, D] (torch Linear layout: [out, in]); b: [D].
    compute_dtype: dtype of the MXU operands (weight + cast activations);
    accumulation and the sigmoid/gate math are always f32.
    """
    N, D = emb.shape
    assert w.shape == (D, D) and b.shape == (D,)
    out_dtype = emb.dtype if out_dtype is None else jnp.dtype(out_dtype)

    # Transpose + cast the weight once in the wrapper; it stays VMEM-resident.
    w_t = w.T.astype(compute_dtype)
    b2 = b.reshape(1, D).astype(jnp.float32)

    in_bytes = jnp.dtype(emb.dtype).itemsize
    out_bytes = jnp.dtype(out_dtype).itemsize
    w_bytes = jnp.dtype(compute_dtype).itemsize

    tm = block_rows if block_rows is not None else _auto_block_rows(
        N, D, in_bytes, out_bytes, w_bytes)
    # Sublane-align (16 covers both f32 and bf16) and never exceed the array.
    tm = max(16, _round_up(min(tm, _round_up(N, 16)), 16))

    grid = pl.cdiv(N, tm)        # ragged last block handled by masked writeback

    block_bytes = (2 * tm * D * in_bytes + 2 * tm * D * out_bytes
                   + 2 * D * D * w_bytes + 2 * D * 4)
    vmem_limit = int(min(block_bytes + (8 << 20), 64 << 20))

    return pl.pallas_call(
        _gating_kernel,
        out_shape=jax.ShapeDtypeStruct((N, D), out_dtype),
        grid_spec=pltpu.PrefetchScalarGridSpec(
            num_scalar_prefetch=0,
            grid=(grid,),
            in_specs=[
                pl.BlockSpec((tm, D), lambda i: (i, 0)),   # emb rows (streamed)
                pl.BlockSpec((D, D), lambda i: (0, 0)),    # Wt (VMEM-resident)
                pl.BlockSpec((1, D), lambda i: (0, 0)),    # bias (VMEM-resident)
            ],
            out_specs=pl.BlockSpec((tm, D), lambda i: (i, 0)),
        ),
        compiler_params=pltpu.CompilerParams(
            dimension_semantics=("parallel",),
            vmem_limit_bytes=vmem_limit,
        ),
    )(emb, w_t, b2)


if __name__ == "__main__":
    key = jax.random.PRNGKey(0)
    k_e, k_w, k_b = jax.random.split(key, 3)

    N, D = 256, 128
    emb = jax.random.normal(k_e, (N, D), dtype=jnp.float32)
    w = jax.random.normal(k_w, (D, D), dtype=jnp.float32) * (1.0 / (D ** 0.5))
    b = jax.random.normal(k_b, (D,), dtype=jnp.float32) * 0.1

    # 1) Default path: bf16 MXU operands, f32 accumulation + gate math.
    out = jax.block_until_ready(gating_layer(emb, w, b))
    emb_q = emb.astype(jnp.bfloat16).astype(jnp.float32)
    w_q = w.astype(jnp.bfloat16).astype(jnp.float32)
    ref_q = emb * jax.nn.sigmoid(emb_q @ w_q.T + b)
    assert out.shape == (N, D)
    assert jnp.allclose(out, ref_q, atol=2e-3, rtol=2e-3), \
        float(jnp.max(jnp.abs(out - ref_q)))

    # 2) f32 compute path + ragged last block (N not a multiple of the tile):
    #    exact parity with the PyTorch module's math, no pad/slice copies.
    N2 = 200
    emb2 = emb[:N2]
    out2 = jax.block_until_ready(
        gating_layer(emb2, w, b, block_rows=64, compute_dtype=jnp.float32))
    ref2 = emb2 * jax.nn.sigmoid(emb2 @ w.T + b)
    assert out2.shape == (N2, D)
    assert jnp.allclose(out2, ref2, atol=1e-5, rtol=1e-5), \
        float(jnp.max(jnp.abs(out2 - ref2)))

    # 3) Fully-bf16 streaming path (halves HBM traffic; out dtype follows emb).
    emb_bf = emb.astype(jnp.bfloat16)
    out3 = jax.block_until_ready(gating_layer(emb_bf, w, b))
    ref3 = emb_q * jax.nn.sigmoid(emb_q @ w_q.T + b)
    assert out3.dtype == jnp.bfloat16
    assert jnp.allclose(out3.astype(jnp.float32), ref3, atol=2e-2, rtol=2e-2), \
        float(jnp.max(jnp.abs(out3.astype(jnp.float32) - ref3)))

    print("KERNEL_OK")
</pallas_src>

<mosaic_0001>
module attributes {stable_mosaic.version = 11 : i64} {
  func.func @_gating_kernel(%arg0: i32, %arg1: memref<64x128xf32, #tpu.memory_space<vmem>>, %arg2: memref<128x128xbf16, #tpu.memory_space<vmem>>, %arg3: memref<1x128xf32, #tpu.memory_space<vmem>>, %arg4: memref<64x128xf32, #tpu.memory_space<vmem>>) attributes {dimension_semantics = [#tpu.dimension_semantics<parallel>], iteration_bounds = array<i64: 4>, scalar_prefetch = 0 : i64, scratch_operands = 0 : i64, tpu.core_type = #tpu.core_type<tc>, window_params = [{transform_indices = @transform_0, window_bounds = array<i64: 64, 128>}, {pipeline_mode = #tpu.pipeline_mode<synchronous>, transform_indices = @transform_1, window_bounds = array<i64: 128, 128>}, {pipeline_mode = #tpu.pipeline_mode<synchronous>, transform_indices = @transform_2, window_bounds = array<i64: 1, 128>}, {transform_indices = @transform_3, window_bounds = array<i64: 64, 128>}]} {
    %c0 = arith.constant 0 : index
    %c0_0 = arith.constant 0 : index
    %0 = vector.load %arg1[%c0, %c0_0] : memref<64x128xf32, #tpu.memory_space<vmem>>, vector<64x128xf32>
    %1 = arith.truncf %0 : vector<64x128xf32> to vector<64x128xbf16>
    %c0_1 = arith.constant 0 : index
    %c0_2 = arith.constant 0 : index
    %2 = vector.load %arg2[%c0_1, %c0_2] : memref<128x128xbf16, #tpu.memory_space<vmem>>, vector<128x128xbf16>
    %cst = arith.constant dense<0.000000e+00> : vector<64x128xf32>
    %3 = tpu.matmul %1, %2, %cst {dimension_numbers = #tpu.dot_dimension_numbers<[1], [0], [0], [1], [0, 0, 1, 1], [], []>} : vector<64x128xbf16>, vector<128x128xbf16>, vector<64x128xf32> -> vector<64x128xf32>
    %c0_3 = arith.constant 0 : index
    %c0_4 = arith.constant 0 : index
    %4 = vector.load %arg3[%c0_3, %c0_4] : memref<1x128xf32, #tpu.memory_space<vmem>>, vector<1x128xf32>
    %5 = vector.broadcast %4 : vector<1x128xf32> to vector<64x128xf32>
    %6 = arith.addf %3, %5 : vector<64x128xf32>
    %7 = arith.negf %6 : vector<64x128xf32>
    %8 = math.exp %7 : vector<64x128xf32>
    %cst_5 = arith.constant 1.000000e+00 : f32
    %9 = vector.broadcast %cst_5 : f32 to vector<64x128xf32>
    %10 = arith.addf %9, %8 : vector<64x128xf32>
    %11 = arith.divf %9, %10 : vector<64x128xf32>
    %12 = arith.mulf %0, %11 : vector<64x128xf32>
    %c0_6 = arith.constant 0 : index
    %c0_7 = arith.constant 0 : index
    %13 = vector.load %arg4[%c0_6, %c0_7] : memref<64x128xf32, #tpu.memory_space<vmem>>, vector<64x128xf32>
    tpu.vector_store %arg4[%c0_6, %c0_7], %12 {strides = array<i32>} : memref<64x128xf32, #tpu.memory_space<vmem>>, vector<64x128xf32>,
    return
  }
  func.func @transform_0(%arg0: i32) -> (i32, i32) {
    %c0_i32 = arith.constant 0 : i32
    %c0_i32_0 = arith.constant 0 : i32
    return %arg0, %c0_i32 : i32, i32
  }
  func.func @transform_1(%arg0: i32) -> (i32, i32) {
    %c0_i32 = arith.constant 0 : i32
    %c0_i32_0 = arith.constant 0 : i32
    %c0_i32_1 = arith.constant 0 : i32
    return %c0_i32, %c0_i32_0 : i32, i32
  }
  func.func @transform_2(%arg0: i32) -> (i32, i32) {
    %c0_i32 = arith.constant 0 : i32
    %c0_i32_0 = arith.constant 0 : i32
    %c0_i32_1 = arith.constant 0 : i32
    return %c0_i32, %c0_i32_0 : i32, i32
  }
  func.func @transform_3(%arg0: i32) -> (i32, i32) {
    %c0_i32 = arith.constant 0 : i32
    %c0_i32_0 = arith.constant 0 : i32
    return %arg0, %c0_i32 : i32, i32
  }
}

</mosaic_0001>

<bundles_post_ra>
// kernel: tpu_custom_call.1
= control target key start
LH: loop header
LB: loop body
LE: loop exit
PB: predicated region body
PF: predicated region fallthrough
CT: control target
= control target key end

     0   :  { %8 = vsyncpa [#allocation3], 0  ;;  %s1205_s0 = inlined_call_operand.hbm [shape: f32[256,128], index: 0, kind: input, shape index: {}]   ;;  %s1206_s1 = inlined_call_operand.hbm [shape: bf16[128,128], index: 1, kind: input, shape index: {}]   ;;  %s1207_s2 = inlined_call_operand.vmem [shape: f32[1,128], index: 2, kind: input, shape index: {}]   ;;  %s1208_s3 = inlined_call_operand.hbm [shape: f32[256,128], index: 3, kind: output, shape index: {}]  }
   0x1   :  { %10 = vsyncpa [#allocation3 + $0x1], 0 }
   0x2   :  { %11 = vsyncpa [#allocation6], 0 }
   0x3   :  { %12 = vsyncpa [#allocation4], 0 }
   0x4   :  { %14 = vsyncpa [#allocation4 + $0x1], 0  ;;  %s931_s12 = smov 0   ;;  %s933_s13 = smov 0  }
   0x5   :  { %s935_s14 = smov 0   ;;  %s937_s15 = smov 0  }
   0x6 LB: > { %s952_s16 = sadd.s32 4294967295, %s902_s15   ;;  %s586_s17 = sadd.s32 4294967294, %s902_s15   ;;  %s902_s15 = sphi %s937_s15, %s1225_s15   ;;  %s898_s14 = sphi %s935_s14, %s1224_s14   ;;  %s894_s13 = sphi %s933_s13, %s1223_s13   ;;  %s890_s12 = sphi %s931_s12, %s1222_s12  }
   0x7   : > { %p40_p0 = scmp.ne.s32.totalorder %s894_s13, %s890_s12  ;;  %p41_p1 = scmp.eq.s32.totalorder %s952_s16, 0 }
   0x8   : > { %p106_p2 = scmp.eq.s32.totalorder %s952_s16, 3  ;;  %p112_p3 = scmp.eq.s32.totalorder %s586_s17, 3 }
   0x9   : > { %p961_p4 = por %p41_p1, %p40_p0  ;;  %p587_p5 = scmp.ge.s32.totalorder %s902_s15, 1 }
   0xa   : > { %p966_p6 = por %p112_p3, %p40_p0  ;;  %p119_p7 = scmp.lt.s32.totalorder %s902_s15, 5 }
   0xb   : > { %s130_s22 = sshll.u32 %s1206_s1, 4  ;;  %s904_s24 = smov [#allocation5]   ;;  %s131_s22 = int_to_ptr.hbm [resolvable:$true] %s130_s22 }
   0xc   : > { %p974_p8 = pnand %p587_p5, %p119_p7  ;;  %s132_s25 = sshll.u32 %s904_s24, 4  ;;  %s133_s25 = int_to_ptr.vmem [resolvable:$true] %s132_s25 }
   0xd   : > { %s983_s26 = sadd.s32 1, %s902_s15   ;;  %s905_s27 = smov 64  }
   0xe   : > { %p684_p9 = pneg %p974_p8  ;;  %s906_s28 = smov 4  }
   0xf   : > { %s24_s29 = ssub.s32 %s902_s15, %s983_s26  ;;  %s27_s30 = sadd.s32 1, %s898_s14 }
  0x10   : > { %p685_p10 = pnand %p684_p9, %p41_p1  ;;  %p25_p11 = scmp.eq.s32.totalorder %s24_s29, 0 }
  0x11   : > { %p34_p12 = scmp.ne.s32.totalorder %s898_s14, %s894_s13  ;;  %p35_p13 = scmp.eq.s32.totalorder %s902_s15, 0 }
  0x12   : > { %687 = dma.hbm_to_vmem [thread:$0]  (!%p685_p10), %s131_s22, 1024, %s133_s25, [#allocation6], %s905_s27, %s905_s27, %s906_s28  }
  0x13   : > { %p697_p0 = scmp.lt.s32.totalorder %s902_s15, 4  ;;  %p36_p3 = por %p35_p13, %p34_p12 }
  0x14   : > { %s993_s4 = scalar_select %p25_p11, %s898_s14, %s27_s30  }
  0x15   : > { %p997_p5 = por %p106_p2, %p34_p12  ;;  %s149_s6 = sand.u32 1, %s898_s14  }
  0x16   : > { %s642_s7 = sshll.u32 %s902_s15, 6  ;;  %s590_s8 = sshll.u32 %s149_s6, 6 }
  0x17   : > { %s158_s11 = scalar_lea.hbm %s1205_s0, %s642_s7  ;;  %s153_s20 = scalar_lea.vmem [#allocation2], %s590_s8 }
  0x18   : > { %s159_s17 = sshll.u32 %s158_s11, 4  ;;  %s161_s21 = sshll.u32 %s153_s20, 4  ;;  %s160_s17 = int_to_ptr.hbm [resolvable:$true] %s159_s17  ;;  %s162_s21 = int_to_ptr.vmem [resolvable:$true] %s161_s21 }
  0x19   : > { %p1008_p7 = pnand %p697_p0, %p36_p3  ;;  %s150_s24 = scalar_lea.sflag [#allocation3], %s149_s6 }
  0x1a   : > { %s802_s25 = sshra.s32 %s160_s17, 4  ;;  %s809_s30 = scalar_lea.hbm %s1205_s0, 256  ;;  %s803_s25 = int_to_ptr.hbm [resolvable:$true] %s802_s25 }
  0x1b   : > { %s804_s27 = scalar_lea.hbm %s803_s25, 64  ;;  %p806_p9 = pneg %p1008_p7 }
  0x1c   : > { %p805_p2 = scmp.ne.s32.totalorder %s803_s25, %s804_s27  ;;  %p810_p12 = scmp.lt.s32.totalorder %s803_s25, %s1205_s0 }
  0x1d   : > { %p811_p13 = scmp.lt.s32.totalorder %s809_s30, %s804_s27 }
  0x1e   : > { %p807_p10 = pnand %p806_p9, %p805_p2 }
  0x1f   : > { %p812_p0 = por %p811_p13, %p810_p12 }
  0x20   : > { %p808_p11 = pneg %p807_p10 }
  0x22   : > { %p813_p3 = pnand %p812_p0, %p808_p11 }
  0x24   : > { %816 = shalt.err (!%p813_p3)
}
  0x25   : > { %s907_s6 = smov 128   ;;  %s908_s9 = smov 8  }
  0x26   : > { %691 = dma.hbm_to_vmem [thread:$0]  (!%p1008_p7), %s160_s17, 1024, %s162_s21, %s150_s24, %s907_s6, %s907_s6, %s908_s9  }
  0x27   : > { %173 = sbr.rel (%p974_p8) target bundleno = 262 (0x106), region = 32  ;;  %s1025_s10 = sand.u32 (!%p974_p8), 1, %s894_s13  }
  0x28   : > { %s594_s11 = sshll.u32 (!%p974_p8), %s1025_s10, 6  ;;  %s176_s20 = scalar_lea.sflag (!%p974_p8), [#allocation3], %s1025_s10 }
  0x29   : > { %s1031_s25 = scalar_lea.vmem (!%p974_p8), [#allocation2], %s594_s11 }
  0x2c   : > { %877 = dma.done.wait (%p961_p4), %s176_s20, 1024  }
  0x2d   : > { %879 = vsyncadd (%p961_p4), %s176_s20, 4294966272 }
  0x2e   : > { %881 = dma.done.wait (%p41_p1), [#allocation6], 1024  }
  0x2f   : > { %883 = vsyncadd (%p41_p1), [#allocation6], 4294966272  ;;  %v650_v0 = vld [vmem:[#allocation5 + $0x38] sm:$0xff]  ;;  %v649_v1 = vld [vmem:[#allocation5 + $0x30] sm:$0xff]  ;;  %s1114_s17 = scalar_lea.vmem [#allocation7], %s594_s11  ;;  %s651_s21 = sshll.u32 %s952_s16, 6 }
  0x30   : > { %290 = vmatpush.bf16.msra.mxu0 %v650_v0  ;;  %652 = vmatpush.bf16.msra.mxu1 %v650_v0  ;;  %v648_v2 = vld [vmem:[#allocation5 + $0x28] sm:$0xff]  ;;  %v647_v3 = vld [vmem:[#allocation5 + $0x20] sm:$0xff]  ;;  %v646_v4 = vld [vmem:[#allocation5 + $0x18] sm:$0xff]  ;;  %s499_s27 = scalar_lea.hbm %s1208_s3, %s651_s21  ;;  %s500_s16 = sshll.u32 %s1114_s17, 4  ;;  %s501_s16 = int_to_ptr.vmem [resolvable:$true] %s500_s16 }
  0x31   : > { %653 = vmatpush.bf16.msra.mxu2 %v650_v0  ;;  %654 = vmatpush.bf16.msra.mxu3 %v650_v0  ;;  %v645_v5 = vld [vmem:[#allocation5 + $0x10] sm:$0xff]  ;;  %v644_v6 = vld [vmem:[#allocation5 + $0x8] sm:$0xff]  ;;  %v643_v7 = vld [vmem:[#allocation5] sm:$0xff]  ;;  %s502_s28 = sshll.u32 %s499_s27, 4  ;;  %s488_s29 = scalar_lea.sflag [#allocation4], %s1025_s10  ;;  %s503_s28 = int_to_ptr.hbm [resolvable:$true] %s502_s28 }
  0x32   : > { %v1042_v8 = vld [vmem:[%s1031_s25] sm:$0xff]  ;;  %v1045_v9 = vld [vmem:[%s1031_s25 + $0x8] sm:$0xff]  ;;  %v1048_v10 = vld [vmem:[%s1031_s25 + $0x10] sm:$0xff]  ;;  %s846_s30 = sshra.s32 %s503_s28, 4  ;;  %s852_s9 = scalar_lea.hbm %s1208_s3, 256  ;;  %s847_s30 = int_to_ptr.hbm [resolvable:$true] %s846_s30 }
  0x33   : > { %v1051_v11 = vld [vmem:[%s1031_s25 + $0x18] sm:$0xff]  ;;  %v1054_v12 = vld [vmem:[%s1031_s25 + $0x20] sm:$0xff]  ;;  %v1057_v13 = vld [vmem:[%s1031_s25 + $0x28] sm:$0xff]  ;;  %v218_v16 = vpack.c.bf16 %v1045_v9, %v1042_v8  ;;  %s848_s7 = scalar_lea.hbm %s847_s30, 64  ;;  %p853_p7 = scmp.lt.s32.totalorder %s847_s30, %s1208_s3 }
  0x34   : > { %291 = vmatpush.bf16.msra.mxu0 %v649_v1  ;;  %655 = vmatpush.bf16.msra.mxu1 %v649_v1  ;;  %v1060_v14 = vld [vmem:[%s1031_s25 + $0x30] sm:$0xff]  ;;  %v1063_v15 = vld [vmem:[%s1031_s25 + $0x38] sm:$0xff]  ;;  %v219_v17 = vpack.c.bf16 %v1051_v11, %v1048_v10  ;;  %v220_v18 = vpack.c.bf16 %v1057_v13, %v1054_v12  ;;  %v739_v20 = vld [vmem:[%s1207_s2] ss:$0 sm:$0xff]  ;;  %p849_p1 = scmp.ne.s32.totalorder %s847_s30, %s848_s7  ;;  %p854_p2 = scmp.lt.s32.totalorder %s852_s9, %s848_s7 }
  0x35   : > { %656 = vmatpush.bf16.msra.mxu2 %v649_v1  ;;  %657 = vmatpush.bf16.msra.mxu3 %v649_v1  ;;  %v221_v19 = vpack.c.bf16 %v1063_v15, %v1060_v14 }
  0x36   : > { %p850_p4 = pnand %p849_p1, %p997_p5  ;;  %p855_p9 = por %p854_p2, %p853_p7 }
  0x38   : > { %292 = vmatpush.bf16.msra.mxu0 %v648_v2  ;;  %658 = vmatpush.bf16.msra.mxu1 %v648_v2  ;;  %p851_p8 = pneg %p850_p4 }
  0x39   : > { %659 = vmatpush.bf16.msra.mxu2 %v648_v2  ;;  %660 = vmatpush.bf16.msra.mxu3 %v648_v2 }
  0x3a   : > { %p856_p10 = pnand %p855_p9, %p851_p8 }
  0x3c   : > { %293 = vmatpush.bf16.msra.mxu0 %v647_v3  ;;  %661 = vmatpush.bf16.msra.mxu1 %v647_v3 }
  0x3d   : > { %662 = vmatpush.bf16.msra.mxu2 %v647_v3  ;;  %663 = vmatpush.bf16.msra.mxu3 %v647_v3 }
  0x40   : > { %294 = vmatpush.bf16.msra.mxu0 %v646_v4  ;;  %664 = vmatpush.bf16.msra.mxu1 %v646_v4 }
  0x41   : > { %665 = vmatpush.bf16.msra.mxu2 %v646_v4  ;;  %666 = vmatpush.bf16.msra.mxu3 %v646_v4 }
  0x44   : > { %295 = vmatpush.bf16.msra.mxu0 %v645_v5  ;;  %667 = vmatpush.bf16.msra.mxu1 %v645_v5 }
  0x45   : > { %668 = vmatpush.bf16.msra.mxu2 %v645_v5  ;;  %669 = vmatpush.bf16.msra.mxu3 %v645_v5 }
  0x48   : > { %296 = vmatpush.bf16.msra.mxu0 %v644_v6  ;;  %670 = vmatpush.bf16.msra.mxu1 %v644_v6 }
  0x49   : > { %671 = vmatpush.bf16.msra.mxu2 %v644_v6  ;;  %672 = vmatpush.bf16.msra.mxu3 %v644_v6 }
  0x4c   : > { %297 = vmatpush.bf16.msra.mxu0 %v643_v7  ;;  %673 = vmatpush.bf16.msra.mxu1 %v643_v7 }
  0x4d   : > { %674 = vmatpush.bf16.msra.mxu2 %v643_v7  ;;  %675 = vmatpush.bf16.msra.mxu3 %v643_v7 }
  0x4f   : > { %298 = vmatmul.bf16.vlgmr.msra.gmra.mxu0 %v218_v16  ;;  %303 = vmatmul.bf16.vlgmr.msra.gmra.mxu1 %v219_v17 }
  0x50   : > { %308 = vmatmul.bf16.vlgmr.msra.gmra.mxu2 %v220_v18  ;;  %313 = vmatmul.bf16.vlgmr.msra.gmra.mxu3 %v221_v19 }
  0xcc   : > { %v299_v21 = vpop.f32.mrf.mxu0  ;;  %v304_v22 = vpop.f32.mrf.mxu1 }
  0xcd   : > { %v300_v23 = vadd.f32 %v739_v20, %v299_v21  ;;  %v305_v24 = vadd.f32 %v739_v20, %v304_v22 }
  0xcf   : > { %v629_v25 = vmul.f32 -1.442695, %v300_v23  ;;  %v631_v26 = vmul.f32 -1.442695, %v305_v24 }
  0xd1   : > { %740 = vpow2.f32 %v629_v25 }
  0xd2   : > { %742 = vpow2.f32 %v631_v26 }
  0xd3   : > { %v309_v27 = vpop.f32.mrf.mxu2  ;;  %v314_v28 = vpop.f32.mrf.mxu3 }
  0xd4   : > { %v310_v29 = vadd.f32 %v739_v20, %v309_v27  ;;  %v315_v30 = vadd.f32 %v739_v20, %v314_v28  ;;  %v301_v31 = vpop.f32.mrf.mxu0  ;;  %v306_v32 = vpop.f32.mrf.mxu1 }
  0xd5   : > { %v302_v33 = vadd.f32 %v739_v20, %v301_v31  ;;  %v307_v34 = vadd.f32 %v739_v20, %v306_v32 }
  0xd6   : > { %v633_v35 = vmul.f32 -1.442695, %v310_v29  ;;  %v635_v36 = vmul.f32 -1.442695, %v315_v30 }
  0xd7   : > { %v741_v37 = vpop.eup %740  ;;  %v630_v40 = vmul.f32 -1.442695, %v302_v33  ;;  %v632_v42 = vmul.f32 -1.442695, %v307_v34 }
  0xd8   : > { %v743_v38 = vpop.eup %742  ;;  %v343_v39 = vadd.f32 1.0, %v741_v37  ;;  %744 = vpow2.f32 %v633_v35 }
  0xd9   : > { %v345_v41 = vadd.f32 1.0, %v743_v38  ;;  %746 = vpow2.f32 %v635_v36 }
  0xda   : > { %748 = vrcp.f32 %v343_v39  ;;  %v360_v51 = vand.u32 2147483647, %v343_v39  ;;  %vm356_vm0 = vweird.f32 %v343_v39  ;;  %v362_v57 = vand.u32 2147483648, %v343_v39 }
  0xdb   : > { %750 = vrcp.f32 %v345_v41  ;;  %v311_v43 = vpop.f32.mrf.mxu2  ;;  %v316_v44 = vpop.f32.mrf.mxu3  ;;  %v390_v62 = vand.u32 2147483647, %v345_v41  ;;  %v392_v63 = vand.u32 2147483648, %v345_v41  ;;  %vm386_vm2 = vweird.f32 %v345_v41 }
  0xdc   : > { %752 = vpow2.f32 %v630_v40  ;;  %v312_v45 = vadd.f32 %v739_v20, %v311_v43  ;;  %v317_v47 = vadd.f32 %v739_v20, %v316_v44  ;;  %vm1082_vm1 = vcmp.eq.f32.partialorder %v360_v51, 8.507059e+37 }
  0xdd   : > { %754 = vpow2.f32 %v632_v42  ;;  %v363_v5 = vor.u32 1.1754944e-38, %v362_v57  ;;  %vm1090_vm5 = vcmp.eq.f32.partialorder %v390_v62, 8.507059e+37  ;;  %v393_v18 = vor.u32 1.1754944e-38, %v392_v63 }
  0xde   : > { %v745_v46 = vpop.eup %744  ;;  %v634_v53 = vmul.f32 -1.442695, %v312_v45  ;;  %v636_v59 = vmul.f32 -1.442695, %v317_v47 }
  0xdf   : > { %v747_v48 = vpop.eup %746  ;;  %v1076_v49 = vadd.f32 1.0, %v745_v46 }
  0xe0   : > { %v749_v50 = vpop.eup %748  ;;  %v1078_v52 = vadd.f32 1.0, %v747_v48 }
  0xe1   : > { %v751_v54 = vpop.eup %750  ;;  %v352_v55 = vmul.f32 %v749_v50, %v343_v39  ;;  %756 = vrcp.f32 %v1076_v49  ;;  %vm357_vm3 = vweird.f32 %v749_v50  ;;  %vm416_vm7 = vweird.f32 %v1076_v49 }
  0xe2   : > { %v753_v56 = vpop.eup %752  ;;  %v382_v58 = vmul.f32 %v751_v54, %v345_v41  ;;  %758 = vrcp.f32 %v1078_v52  ;;  %vm387_vm4 = vweird.f32 %v751_v54  ;;  %vm358_vm6 = vmor %vm356_vm0, %vm357_vm3  ;;  %v420_v21 = vand.u32 2147483647, %v1076_v49 }
  0xe3   : > { %v755_v60 = vpop.eup %754  ;;  %v353_v61 = vsub.f32 1.0, %v352_v55  ;;  %760 = vpow2.f32 %v634_v53  ;;  %v1086_v3 = vadd.f32 1.0, %v753_v56  ;;  %vm388_vm8 = vmor %vm386_vm2, %vm387_vm4  ;;  %v422_v24 = vand.u32 2147483648, %v1076_v49 }
  0xe4   : > { %v383_v1 = vsub.f32 1.0, %v382_v58  ;;  %v1088_v4 = vadd.f32 1.0, %v755_v60  ;;  %762 = vpow2.f32 %v636_v59  ;;  %v450_v25 = vand.u32 2147483647, %v1078_v52 }
  0xe5   : > { %v354_v2 = vmul.f32 %v749_v50, %v353_v61  ;;  %764 = vrcp.f32 %v1086_v3  ;;  %vm446_vm9 = vweird.f32 %v1078_v52  ;;  %v452_v33 = vand.u32 2147483648, %v1078_v52 }
  0xe6   : > { %v384_v6 = vmul.f32 %v751_v54, %v383_v1  ;;  %766 = vrcp.f32 %v1088_v4  ;;  %vm1117_vm11 = vcmp.eq.f32.partialorder %v420_v21, 8.507059e+37  ;;  %v423_v39 = vor.u32 1.1754944e-38, %v422_v24 }
  0xe7   : > { %v757_v7 = vpop.eup %756  ;;  %v355_v16 = vadd.f32 %v749_v50, %v354_v2  ;;  %vm1121_vm12 = vcmp.eq.f32.partialorder %v450_v25, 8.507059e+37  ;;  %v453_v45 = vor.u32 1.1754944e-38, %v452_v33  ;;  %vm371_vm15 = vweird.f32 %v1086_v3 }
  0xe8   : > { %v385_v19 = vadd.f32 %v751_v54, %v384_v6  ;;  %v412_v20 = vmul.f32 %v757_v7, %v1076_v49  ;;  %v759_v22 = vpop.eup %758  ;;  %vm417_vm10 = vweird.f32 %v757_v7  ;;  %v375_v49 = vand.u32 2147483647, %v1086_v3 }
  0xe9   : > { %v359_v23 = vsel %vm358_vm6, %v749_v50, %v355_v16  ;;  %v761_v26 = vpop.eup %760  ;;  %v442_v30 = vmul.f32 %v759_v22, %v1078_v52  ;;  %vm447_vm13 = vweird.f32 %v759_v22  ;;  %vm418_vm14 = vmor %vm416_vm7, %vm417_vm10  ;;  %v405_v60 = vand.u32 2147483647, %v1088_v4 }
  0xea   : > { %v364_v27 = vsel %vm1082_vm1, %v363_v5, %v359_v23  ;;  %v389_v28 = vsel %vm388_vm8, %v751_v54, %v385_v19  ;;  %v413_v29 = vsub.f32 1.0, %v412_v20  ;;  %v763_v34 = vpop.eup %762  ;;  %vm448_vm0 = vmor %vm446_vm9, %vm447_vm13  ;;  %v377_v54 = vand.u32 2147483648, %v1086_v3 }
  0xeb   : > { %v471_v31 = vmul.f32 %v364_v27, %v1042_v8  ;;  %v394_v32 = vsel %vm1090_vm5, %v393_v18, %v389_v28  ;;  %v443_v37 = vsub.f32 1.0, %v442_v30  ;;  %v765_v38 = vpop.eup %764  ;;  %v1134_v46 = vadd.f32 1.0, %v763_v34 }
  0xec   : > { %v473_v35 = vmul.f32 %v394_v32, %v1048_v10  ;;  %v414_v36 = vmul.f32 %v757_v7, %v413_v29  ;;  %v1125_v10 = vadd.f32 1.0, %v761_v26  ;;  %v367_v43 = vmul.f32 %v765_v38, %v1086_v3  ;;  %v767_v44 = vpop.eup %766 }
  0xed   : > { %479 = vst [vmem:[%s1114_s17] sm:$0xff] %v471_v31  ;;  %v444_v42 = vmul.f32 %v759_v22, %v443_v37  ;;  %v397_v51 = vmul.f32 %v767_v44, %v1088_v4  ;;  %vm372_vm1 = vweird.f32 %v765_v38  ;;  %v407_v61 = vand.u32 2147483648, %v1088_v4 }
  0xee   : > { %481 = vst [vmem:[%s1114_s17 + $0x10] sm:$0xff] %v473_v35  ;;  %v415_v41 = vadd.f32 %v757_v7, %v414_v36  ;;  %768 = vrcp.f32 %v1125_v10  ;;  %v368_v50 = vsub.f32 1.0, %v367_v43  ;;  %vm402_vm2 = vweird.f32 %v767_v44  ;;  %vm373_vm3 = vmor %vm371_vm15, %vm372_vm1 }
  0xef   : > { %v445_v48 = vadd.f32 %v759_v22, %v444_v42  ;;  %v398_v58 = vsub.f32 1.0, %v397_v51  ;;  %770 = vrcp.f32 %v1134_v46  ;;  %vm376_vm4 = vcmp.eq.f32.partialorder %v375_v49, 8.507059e+37 }
  0xf0   : > { %v419_v47 = vsel %vm418_vm14, %v757_v7, %v415_v41  ;;  %v369_v57 = vmul.f32 %v765_v38, %v368_v50  ;;  %v378_v0 = vor.u32 1.1754944e-38, %v377_v54  ;;  %vm401_vm5 = vweird.f32 %v1088_v4 }
  0xf1   : > { %v424_v53 = vsel %vm1117_vm11, %v423_v39, %v419_v47  ;;  %v449_v56 = vsel %vm448_vm0, %v759_v22, %v445_v48  ;;  %v399_v63 = vmul.f32 %v767_v44, %v398_v58  ;;  %vm403_vm6 = vmor %vm401_vm5, %vm402_vm2  ;;  %vm406_vm7 = vcmp.eq.f32.partialorder %v405_v60, 8.507059e+37 }
  0xf2   : > { %v475_v55 = vmul.f32 %v424_v53, %v1054_v12  ;;  %v454_v59 = vsel %vm1121_vm12, %v453_v45, %v449_v56  ;;  %v370_v62 = vadd.f32 %v765_v38, %v369_v57  ;;  %v435_v19 = vand.u32 2147483647, %v1125_v10 }
  0xf3   : > { %v477_v52 = vmul.f32 %v454_v59, %v1060_v14  ;;  %v400_v2 = vadd.f32 %v767_v44, %v399_v63  ;;  %v408_v14 = vor.u32 1.1754944e-38, %v407_v61  ;;  %v437_v20 = vand.u32 2147483648, %v1125_v10 }
  0xf4   : > { %483 = vst [vmem:[%s1114_s17 + $0x20] sm:$0xff] %v475_v55  ;;  %v769_v12 = vpop.eup %768  ;;  %v374_v1 = vsel %vm373_vm3, %v765_v38, %v370_v62  ;;  %vm431_vm9 = vweird.f32 %v1125_v10  ;;  %vm436_vm11 = vcmp.eq.f32.partialorder %v435_v19, 8.507059e+37  ;;  %v467_v25 = vand.u32 2147483648, %v1134_v46 }
  0xf5   : > { %485 = vst [vmem:[%s1114_s17 + $0x30] sm:$0xff] %v477_v52  ;;  %v427_v5 = vmul.f32 %v769_v12, %v1125_v10  ;;  %v379_v6 = vsel %vm376_vm4, %v378_v0, %v374_v1  ;;  %v404_v16 = vsel %vm403_vm6, %v767_v44, %v400_v2  ;;  %v771_v17 = vpop.eup %770  ;;  %vm432_vm8 = vweird.f32 %v769_v12 }
  0xf6   : > { %v472_v7 = vmul.f32 %v379_v6, %v1045_v9  ;;  %v409_v18 = vsel %vm406_vm7, %v408_v14, %v404_v16  ;;  %v457_v22 = vmul.f32 %v771_v17, %v1134_v46  ;;  %vm433_vm10 = vmor %vm431_vm9, %vm432_vm8  ;;  %v438_v24 = vor.u32 1.1754944e-38, %v437_v20 }
  0xf7   : > { %v428_v3 = vsub.f32 1.0, %v427_v5  ;;  %v474_v4 = vmul.f32 %v409_v18, %v1051_v11  ;;  %vm462_vm12 = vweird.f32 %v771_v17  ;;  %v465_v27 = vand.u32 2147483647, %v1134_v46 }
  0xf8   : > { %480 = vst [vmem:[%s1114_s17 + $0x8] sm:$0xff] %v472_v7  ;;  %v458_v9 = vsub.f32 1.0, %v457_v22  ;;  %vm461_vm13 = vweird.f32 %v1134_v46  ;;  %v468_v31 = vor.u32 1.1754944e-38, %v467_v25 }
  0xf9   : > { %v429_v21 = vmul.f32 %v769_v12, %v428_v3  ;;  %482 = vst [vmem:[%s1114_s17 + $0x18] sm:$0xff] %v474_v4  ;;  %vm463_vm14 = vmor %vm461_vm13, %vm462_vm12  ;;  %vm466_vm15 = vcmp.eq.f32.partialorder %v465_v27, 8.507059e+37 }
  0xfa   : > { %v459_v26 = vmul.f32 %v771_v17, %v458_v9 }
  0xfb   : > { %v430_v23 = vadd.f32 %v769_v12, %v429_v21 }
  0xfc   : > { %v460_v30 = vadd.f32 %v771_v17, %v459_v26 }
  0xfd   : > { %v434_v11 = vsel %vm433_vm10, %v769_v12, %v430_v23 }
  0xfe   : > { %v439_v28 = vsel %vm436_vm11, %v438_v24, %v434_v11  ;;  %v464_v32 = vsel %vm463_vm14, %v771_v17, %v460_v30 }
  0xff   : > { %v476_v29 = vmul.f32 %v439_v28, %v1057_v13  ;;  %v469_v33 = vsel %vm466_vm15, %v468_v31, %v464_v32 }
 0x100   : > { %v478_v34 = vmul.f32 %v469_v33, %v1063_v15 }
 0x101   : > { %484 = vst [vmem:[%s1114_s17 + $0x28] sm:$0xff] %v476_v29 }
 0x102   : > { %486 = vst [vmem:[%s1114_s17 + $0x38] sm:$0xff] %v478_v34 }
 0x103   : > { %859 = shalt.err (!%p856_p10)
}
 0x104   : > { %s909_s10 = smov 128   ;;  %s910_s25 = smov 8  }
 0x105   : > { %682 = dma.vmem_to_hbm [thread:$0]  (%p997_p5), %s501_s16, 1024, %s503_s28, %s488_s29, %s909_s10, %s909_s10, %s910_s25  }
 0x106 PF: > { %p699_p11 = scmp.ge.s32.totalorder %s902_s15, 2  ;;  %s517_s18 = sand.u32 1, %s890_s12  }
 0x107   : > { %s518_s23 = scalar_lea.sflag [#allocation4], %s517_s18 }
 0x108   : > { %p693_p12 = pnand %p699_p11, %p966_p6 }
 0x10a   : > { %p694_p13 = pneg %p693_p12 }
 0x10c   : > { %885 = dma.done.wait (%p694_p13), %s518_s23, 1024  }
 0x10d   : > { %887 = vsyncadd (%p694_p13), %s518_s23, 4294966272  ;;  %p17_p0 = scmp.ge.s32.totalorder %s983_s26, 6   ;;  %s1222_s12 = smov %s894_s13 }
 0x10e   : > { %s1223_s13 = smov %s898_s14  ;;  %s1224_s14 = smov %s993_s4 }
 0x10f   : > { %s1225_s15 = smov %s983_s26  ;;  %19 = sbr.rel (!%p17_p0) target bundleno = 6 (0x6), region = 81 }
 0x114   :  { %524 = vsyncpa [#allocation3], 1 }
 0x115   :  { %526 = vsyncpa [#allocation3 + $0x1], 1 }
 0x116   :  { %527 = vsyncpa [#allocation6], 1 }
 0x117   :  { %528 = vsyncpa [#allocation4], 1 }
 0x118   :  { %530 = vsyncpa [#allocation4 + $0x1], 1 }

</bundles_post_ra>
